<compile_context>
chip_gen: v5e
topology: v5e:2x2
jax: 0.10.0
libtpu: 0.0.40
codegen_flags: <defaults>
</compile_context>

<pallas_src>
import functools

import numpy as np
import jax
import jax.numpy as jnp
from jax import lax
from jax.experimental import pallas as pl
from jax.experimental.pallas import tpu as pltpu


def _round_up(x, m):
    return ((x + m - 1) // m) * m


# -----------------------------------------------------------------------------
# Kernel
# -----------------------------------------------------------------------------
def _centralized_q_kernel(x_ref, w1_ref, wheads_ref, small_ref, out_ref,
                          *, S, A, H, head_pad):
    TB = out_ref.shape[0]
    AA = A * A
    HW = A + AA                       # per-head output width (mu | L_flat)

    # Packed activations: [TB, S + 2A] -> state / u_action / v_action.
    s = x_ref[:, 0:S]
    ua = x_ref[:, S:S + A]
    va = x_ref[:, S + A:S + 2 * A]

    # Packed small params (one (8, lane) buffer, static-offset slices are cheap).
    b1 = small_ref[0:1, 0:3 * H]          # fused first-layer bias        [1, 3H]
    bh_u = small_ref[1:2, 0:HW]           # u-head bias (mu | L)          [1, HW]
    bh_v = small_ref[2:3, 0:HW]           # v-head bias (mu | L)          [1, HW]
    wv2_row = small_ref[3:4, 0:H]         # value-head weight as a row    [1, H]
    bv2 = small_ref[4:5, 0:1]             # value-head bias               [1, 1]
    low_mask = small_ref[5:6, 0:AA] > 0.5     # strict-lower mask (flattened)
    diag_mask = small_ref[6:7, 0:AA] > 0.5    # diagonal mask (flattened)

    # ---- Fused first layer: one [S, 3H] matmul feeds V / u-head / v-head ----
    h_all = jnp.dot(s, w1_ref[...], preferred_element_type=jnp.float32) + b1
    h_all = jnp.maximum(h_all, 0.0)                                   # ReLU
    hv = h_all[:, 0:H]
    hu = h_all[:, H:2 * H]
    hm = h_all[:, 2 * H:3 * H]

    # ---- Value head: N=1 matmul replaced by a VPU multiply + lane reduce ----
    v = jnp.sum(hv * wv2_row, axis=-1, keepdims=True) + bv2           # [TB, 1]

    # ---- NAF advantage, masking kept in the 2-D [TB, A*A] lane layout ----
    def advantage(h, action, w_head, b_head):
        # Fused (mu | L) matmul: one [H, A + A*A] pass per head.
        head = jnp.dot(h, w_head, preferred_element_type=jnp.float32) + b_head
        mu = jnp.tanh(head[:, 0:A])                                   # [TB, A]
        lf = head[:, A:HW]                                            # [TB, A*A]
        # Select (not mask-multiply) so inf from exp() of an off-diagonal
        # pre-activation can never turn into NaN.
        ltri = (jnp.where(low_mask, lf, 0.0)
                + jnp.where(diag_mask, jnp.exp(lf), 0.0))             # [TB, A*A]
        d = action - mu                                               # [TB, A]
        # Single reshape, only right before the i-reduction.
        l3 = ltri.reshape(TB, A, A)                                   # [TB, A, A]
        m = jnp.sum(l3 * d[:, :, None], axis=1)                       # (L^T d)  [TB, A]
        return -0.5 * jnp.sum(m * m, axis=-1, keepdims=True)          # [TB, 1]

    w_head_u = wheads_ref[:, 0:HW]                     # tile-aligned lane slices
    w_head_v = wheads_ref[:, head_pad:head_pad + HW]

    adv_u = advantage(hu, ua, w_head_u, bh_u)
    adv_v = advantage(hm, va, w_head_v, bh_v)

    # TODO(synk): output stays [B, 1] (lane width 1 -> masked stores) to match the
    # module's return shape; fuse into a lane-dense slab if embedded in a bigger kernel.
    out_ref[...] = v + adv_u - adv_v


# -----------------------------------------------------------------------------
# Parameter packing (done once on the wrapper side)
# -----------------------------------------------------------------------------
def pack_params(params, state_dim, action_dim, hidden):
    S, A, H = state_dim, action_dim, hidden
    AA = A * A
    HW = A + AA
    (wv1, bv1, wv2, bv2,
     wu1, bu1, wmu_u, bmu_u, wl_u, bl_u,
     wm1, bm1, wmu_v, bmu_v, wl_v, bl_v) = params

    # Fused first-layer weights: [S, 3H]
    w1_all = jnp.concatenate([wv1, wu1, wm1], axis=1).astype(jnp.float32)

    # Fused per-head (mu | L) weights, each padded to a 128-lane boundary so the
    # kernel slices them at tile-aligned offsets: [H, 2 * head_pad]
    head_pad = _round_up(HW, 128)

    def pad_cols(w, width):
        return jnp.pad(w, ((0, 0), (0, width - w.shape[1])))

    w_head_u = pad_cols(jnp.concatenate([wmu_u, wl_u], axis=1), head_pad)
    w_head_v = pad_cols(jnp.concatenate([wmu_v, wl_v], axis=1), head_pad)
    w_heads = jnp.concatenate([w_head_u, w_head_v], axis=1).astype(jnp.float32)

    # All bias-sized params + static tril/diag masks in one (8, lane) buffer.
    lane = _round_up(max(3 * H, HW, H, AA, 1), 128)
    idx = np.arange(AA)
    ii, jj = idx // A, idx % A
    rows = [
        jnp.concatenate([bv1, bu1, bm1], axis=1),          # 0: fused first-layer bias [1, 3H]
        jnp.concatenate([bmu_u, bl_u], axis=1),            # 1: u-head bias            [1, HW]
        jnp.concatenate([bmu_v, bl_v], axis=1),            # 2: v-head bias            [1, HW]
        wv2.T,                                             # 3: value weight row       [1, H]
        bv2,                                               # 4: value bias             [1, 1]
        jnp.asarray((jj < ii)[None, :], jnp.float32),      # 5: strict lower mask      [1, AA]
        jnp.asarray((jj == ii)[None, :], jnp.float32),     # 6: diagonal mask          [1, AA]
    ]
    rows = [jnp.pad(r.astype(jnp.float32), ((0, 0), (0, lane - r.shape[1]))) for r in rows]
    n_rows = _round_up(len(rows), 8)
    small = jnp.concatenate(
        rows + [jnp.zeros((n_rows - len(rows), lane), jnp.float32)], axis=0)

    return w1_all, w_heads, small, head_pad


# -----------------------------------------------------------------------------
# Wrapper
# -----------------------------------------------------------------------------
def centralized_q_forward(state, u_action, v_action, packed, *,
                          state_dim, action_dim, hidden, block_batch=256):
    """Q(s, a_u, a_v) = V(s) + A_u(s, a_u) - A_v(s, a_v).  Returns [B, 1]."""
    w1_all, w_heads, small, head_pad = packed
    S, A, H = state_dim, action_dim, hidden
    B = state.shape[0]

    # Pack activations into one buffer -> one activation DMA per batch tile.
    x = jnp.concatenate([state, u_action, v_action], axis=1).astype(jnp.float32)

    TB = B if B <= block_batch else block_batch            # batch tile (multiple of 8 when < B)
    grid = (pl.cdiv(B, TB),)

    kernel = functools.partial(_centralized_q_kernel,
                               S=S, A=A, H=H, head_pad=head_pad)

    return pl.pallas_call(
        kernel,
        grid=grid,
        in_specs=[
            pl.BlockSpec((TB, S + 2 * A), lambda i: (i, 0)),   # activations: batch-tiled
            pl.BlockSpec(w1_all.shape, lambda i: (0, 0)),      # weights: resident
            pl.BlockSpec(w_heads.shape, lambda i: (0, 0)),
            pl.BlockSpec(small.shape, lambda i: (0, 0)),
        ],
        out_specs=pl.BlockSpec((TB, 1), lambda i: (i, 0)),
        out_shape=jax.ShapeDtypeStruct((B, 1), jnp.float32),
        compiler_params=pltpu.CompilerParams(
            dimension_semantics=("parallel",)),                # megacore-friendly batch axis
    )(x, w1_all, w_heads, small)


# -----------------------------------------------------------------------------
# Pure-JAX reference (mirrors the original module math, unpacked params)
# -----------------------------------------------------------------------------
def reference_forward(state, u_action, v_action, params):
    (wv1, bv1, wv2, bv2,
     wu1, bu1, wmu_u, bmu_u, wl_u, bl_u,
     wm1, bm1, wmu_v, bmu_v, wl_v, bl_v) = params

    hv = jnp.maximum(state @ wv1 + bv1, 0.0)
    v = hv @ wv2 + bv2

    def adv(action, w1, b1, wmu, bmu, wl, bl):
        h = jnp.maximum(state @ w1 + b1, 0.0)
        mu = jnp.tanh(h @ wmu + bmu)
        a = mu.shape[1]
        l3 = (h @ wl + bl).reshape(-1, a, a)
        ii = lax.broadcasted_iota(jnp.int32, l3.shape, 1)
        jj = lax.broadcasted_iota(jnp.int32, l3.shape, 2)
        ltri = jnp.where(jj < ii, l3, 0.0) + jnp.where(jj == ii, jnp.exp(l3), 0.0)
        d = action - mu
        m = jnp.einsum("bij,bi->bj", ltri, d)
        return -0.5 * jnp.sum(m * m, axis=-1, keepdims=True)

    adv_u = adv(u_action, wu1, bu1, wmu_u, bmu_u, wl_u, bl_u)
    adv_v = adv(v_action, wm1, bm1, wmu_v, bmu_v, wl_v, bl_v)
    return v + adv_u - adv_v


# -----------------------------------------------------------------------------
# Deterministic parameter construction
# -----------------------------------------------------------------------------
def make_params(key, state_dim, action_dim, hidden):
    keys = jax.random.split(key, 16)
    k = iter(keys)

    def lin(kk, fan_in, fan_out):
        scale = 1.0 / jnp.sqrt(jnp.float32(fan_in))
        w = jax.random.uniform(kk, (fan_in, fan_out), jnp.float32, -scale, scale)
        b = jnp.zeros((1, fan_out), jnp.float32)
        return w, b

    wv1, bv1 = lin(next(k), state_dim, hidden)
    wv2, bv2 = lin(next(k), hidden, 1)
    wu1, bu1 = lin(next(k), state_dim, hidden)
    wmu_u, bmu_u = lin(next(k), hidden, action_dim)
    wl_u, bl_u = lin(next(k), hidden, action_dim * action_dim)
    wm1, bm1 = lin(next(k), state_dim, hidden)
    wmu_v, bmu_v = lin(next(k), hidden, action_dim)
    wl_v, bl_v = lin(next(k), hidden, action_dim * action_dim)

    return (wv1, bv1, wv2, bv2,
            wu1, bu1, wmu_u, bmu_u, wl_u, bl_u,
            wm1, bm1, wmu_v, bmu_v, wl_v, bl_v)


# -----------------------------------------------------------------------------
# Main
# -----------------------------------------------------------------------------
if __name__ == "__main__":
    S, A, H = 16, 8, 32          # state_dim, action_dim, hidden

    key = jax.random.PRNGKey(0)
    k_state, k_ua, k_va, k_params = jax.random.split(key, 4)
    params = make_params(k_params, S, A, H)
    packed = pack_params(params, S, A, H)

    # Case 1: small batch, single grid step.
    B = 8
    state = jax.random.normal(k_state, (B, S), jnp.float32)
    u_action = jax.random.uniform(k_ua, (B, A), jnp.float32, -1.0, 1.0)
    v_action = jax.random.uniform(k_va, (B, A), jnp.float32, -1.0, 1.0)

    q = centralized_q_forward(state, u_action, v_action, packed,
                              state_dim=S, action_dim=A, hidden=H)
    q = jax.block_until_ready(q)
    q_ref = reference_forward(state, u_action, v_action, params)
    assert q.shape == (B, 1)
    assert jnp.allclose(q, q_ref, atol=1e-4, rtol=1e-4), (q, q_ref)

    # Case 2: larger batch, tiled over the ("parallel") grid axis.
    B2 = 64
    k2s, k2u, k2v = jax.random.split(jax.random.PRNGKey(1), 3)
    state2 = jax.random.normal(k2s, (B2, S), jnp.float32)
    u2 = jax.random.uniform(k2u, (B2, A), jnp.float32, -1.0, 1.0)
    v2 = jax.random.uniform(k2v, (B2, A), jnp.float32, -1.0, 1.0)

    q2 = centralized_q_forward(state2, u2, v2, packed,
                               state_dim=S, action_dim=A, hidden=H, block_batch=16)
    q2 = jax.block_until_ready(q2)
    q2_ref = reference_forward(state2, u2, v2, params)
    assert jnp.allclose(q2, q2_ref, atol=1e-4, rtol=1e-4), (q2, q2_ref)

    print("KERNEL_OK")
</pallas_src>

<mosaic_0001>
module attributes {stable_mosaic.version = 11 : i64} {
  func.func @_centralized_q_kernel(%arg0: i32, %arg1: memref<8x32xf32, #tpu.memory_space<vmem>>, %arg2: memref<16x96xf32, #tpu.memory_space<vmem>>, %arg3: memref<32x256xf32, #tpu.memory_space<vmem>>, %arg4: memref<8x128xf32, #tpu.memory_space<vmem>>, %arg5: memref<8x1xf32, #tpu.memory_space<vmem>>) attributes {dimension_semantics = [#tpu.dimension_semantics<parallel>], iteration_bounds = array<i64: 1>, scalar_prefetch = 0 : i64, scratch_operands = 0 : i64, tpu.core_type = #tpu.core_type<tc>, window_params = [{transform_indices = @transform_0, window_bounds = array<i64: 8, 32>}, {pipeline_mode = #tpu.pipeline_mode<synchronous>, transform_indices = @transform_1, window_bounds = array<i64: 16, 96>}, {pipeline_mode = #tpu.pipeline_mode<synchronous>, transform_indices = @transform_2, window_bounds = array<i64: 32, 256>}, {pipeline_mode = #tpu.pipeline_mode<synchronous>, transform_indices = @transform_3, window_bounds = array<i64: 8, 128>}, {transform_indices = @transform_4, window_bounds = array<i64: 8, 1>}]} {
    %c0 = arith.constant 0 : index
    %c0_0 = arith.constant 0 : index
    %0 = vector.load %arg1[%c0, %c0_0] : memref<8x32xf32, #tpu.memory_space<vmem>>, vector<8x16xf32>
    %c0_1 = arith.constant 0 : index
    %c16 = arith.constant 16 : index
    %1 = vector.load %arg1[%c0_1, %c16] : memref<8x32xf32, #tpu.memory_space<vmem>>, vector<8x8xf32>
    %c0_2 = arith.constant 0 : index
    %c24 = arith.constant 24 : index
    %2 = vector.load %arg1[%c0_2, %c24] : memref<8x32xf32, #tpu.memory_space<vmem>>, vector<8x8xf32>
    %c0_3 = arith.constant 0 : index
    %c0_4 = arith.constant 0 : index
    %3 = vector.load %arg4[%c0_3, %c0_4] : memref<8x128xf32, #tpu.memory_space<vmem>>, vector<1x96xf32>
    %c1 = arith.constant 1 : index
    %c0_5 = arith.constant 0 : index
    %4 = vector.load %arg4[%c1, %c0_5] : memref<8x128xf32, #tpu.memory_space<vmem>>, vector<1x72xf32>
    %c2 = arith.constant 2 : index
    %c0_6 = arith.constant 0 : index
    %5 = vector.load %arg4[%c2, %c0_6] : memref<8x128xf32, #tpu.memory_space<vmem>>, vector<1x72xf32>
    %c3 = arith.constant 3 : index
    %c0_7 = arith.constant 0 : index
    %6 = vector.load %arg4[%c3, %c0_7] : memref<8x128xf32, #tpu.memory_space<vmem>>, vector<1x32xf32>
    %c4 = arith.constant 4 : index
    %c0_8 = arith.constant 0 : index
    %7 = vector.load %arg4[%c4, %c0_8] : memref<8x128xf32, #tpu.memory_space<vmem>>, vector<1x1xf32>
    %c5 = arith.constant 5 : index
    %c0_9 = arith.constant 0 : index
    %8 = vector.load %arg4[%c5, %c0_9] : memref<8x128xf32, #tpu.memory_space<vmem>>, vector<1x64xf32>
    %cst = arith.constant 5.000000e-01 : f32
    %9 = vector.broadcast %cst : f32 to vector<1x64xf32>
    %10 = arith.cmpf ogt, %8, %9 : vector<1x64xf32>
    %c6 = arith.constant 6 : index
    %c0_10 = arith.constant 0 : index
    %11 = vector.load %arg4[%c6, %c0_10] : memref<8x128xf32, #tpu.memory_space<vmem>>, vector<1x64xf32>
    %cst_11 = arith.constant 5.000000e-01 : f32
    %12 = vector.broadcast %cst_11 : f32 to vector<1x64xf32>
    %13 = arith.cmpf ogt, %11, %12 : vector<1x64xf32>
    %c0_12 = arith.constant 0 : index
    %c0_13 = arith.constant 0 : index
    %14 = vector.load %arg2[%c0_12, %c0_13] : memref<16x96xf32, #tpu.memory_space<vmem>>, vector<16x96xf32>
    %cst_14 = arith.constant dense<0.000000e+00> : vector<8x96xf32>
    %15 = tpu.matmul %0, %14, %cst_14 {dimension_numbers = #tpu.dot_dimension_numbers<[1], [0], [0], [1], [0, 0, 1, 1], [], []>} : vector<8x16xf32>, vector<16x96xf32>, vector<8x96xf32> -> vector<8x96xf32>
    %16 = vector.broadcast %3 : vector<1x96xf32> to vector<8x96xf32>
    %17 = arith.addf %15, %16 : vector<8x96xf32>
    %cst_15 = arith.constant 0.000000e+00 : f32
    %18 = vector.broadcast %cst_15 : f32 to vector<8x96xf32>
    %19 = arith.maximumf %17, %18 : vector<8x96xf32>
    %20 = vector.extract_strided_slice %19 {offsets = [0, 0], sizes = [8, 32], strides = [1, 1]} : vector<8x96xf32> to vector<8x32xf32>
    %21 = vector.extract_strided_slice %19 {offsets = [0, 32], sizes = [8, 32], strides = [1, 1]} : vector<8x96xf32> to vector<8x32xf32>
    %22 = vector.extract_strided_slice %19 {offsets = [0, 64], sizes = [8, 32], strides = [1, 1]} : vector<8x96xf32> to vector<8x32xf32>
    %23 = vector.broadcast %6 : vector<1x32xf32> to vector<8x32xf32>
    %24 = arith.mulf %20, %23 : vector<8x32xf32>
    %cst_16 = arith.constant dense<0.000000e+00> : vector<8xf32>
    %25 = vector.multi_reduction <add>, %24, %cst_16 [1] : vector<8x32xf32> to vector<8xf32>
    %26 = vector.shape_cast %25 : vector<8xf32> to vector<8x1xf32>
    %27 = vector.broadcast %7 : vector<1x1xf32> to vector<8x1xf32>
    %28 = arith.addf %26, %27 : vector<8x1xf32>
    %c0_17 = arith.constant 0 : index
    %c0_18 = arith.constant 0 : index
    %29 = vector.load %arg3[%c0_17, %c0_18] : memref<32x256xf32, #tpu.memory_space<vmem>>, vector<32x72xf32>
    %c0_19 = arith.constant 0 : index
    %c128 = arith.constant 128 : index
    %30 = vector.load %arg3[%c0_19, %c128] : memref<32x256xf32, #tpu.memory_space<vmem>>, vector<32x72xf32>
    %cst_20 = arith.constant dense<0.000000e+00> : vector<8x72xf32>
    %31 = tpu.matmul %21, %29, %cst_20 {dimension_numbers = #tpu.dot_dimension_numbers<[1], [0], [0], [1], [0, 0, 1, 1], [], []>} : vector<8x32xf32>, vector<32x72xf32>, vector<8x72xf32> -> vector<8x72xf32>
    %32 = vector.broadcast %4 : vector<1x72xf32> to vector<8x72xf32>
    %33 = arith.addf %31, %32 : vector<8x72xf32>
    %34 = vector.extract_strided_slice %33 {offsets = [0, 0], sizes = [8, 8], strides = [1, 1]} : vector<8x72xf32> to vector<8x8xf32>
    %35 = math.tanh %34 : vector<8x8xf32>
    %36 = vector.extract_strided_slice %33 {offsets = [0, 8], sizes = [8, 64], strides = [1, 1]} : vector<8x72xf32> to vector<8x64xf32>
    %cst_21 = arith.constant 0.000000e+00 : f32
    %37 = vector.shape_cast %10 : vector<1x64xi1> to vector<1x64xi1>
    %38 = vector.broadcast %37 : vector<1x64xi1> to vector<8x64xi1>
    %39 = vector.broadcast %cst_21 : f32 to vector<8x64xf32>
    %40 = arith.select %38, %36, %39 : vector<8x64xi1>, vector<8x64xf32>
    %41 = math.exp %36 : vector<8x64xf32>
    %cst_22 = arith.constant 0.000000e+00 : f32
    %42 = vector.shape_cast %13 : vector<1x64xi1> to vector<1x64xi1>
    %43 = vector.broadcast %42 : vector<1x64xi1> to vector<8x64xi1>
    %44 = vector.broadcast %cst_22 : f32 to vector<8x64xf32>
    %45 = arith.select %43, %41, %44 : vector<8x64xi1>, vector<8x64xf32>
    %46 = arith.addf %40, %45 : vector<8x64xf32>
    %47 = arith.subf %1, %35 : vector<8x8xf32>
    %48 = vector.shape_cast %46 : vector<8x64xf32> to vector<8x8x8xf32>
    %49 = vector.shape_cast %47 : vector<8x8xf32> to vector<8x8x1xf32>
    %50 = vector.broadcast %49 : vector<8x8x1xf32> to vector<8x8x8xf32>
    %51 = arith.mulf %48, %50 : vector<8x8x8xf32>
    %cst_23 = arith.constant dense<0.000000e+00> : vector<8x8xf32>
    %52 = vector.multi_reduction <add>, %51, %cst_23 [1] : vector<8x8x8xf32> to vector<8x8xf32>
    %53 = arith.mulf %52, %52 : vector<8x8xf32>
    %cst_24 = arith.constant dense<0.000000e+00> : vector<8xf32>
    %54 = vector.multi_reduction <add>, %53, %cst_24 [1] : vector<8x8xf32> to vector<8xf32>
    %55 = vector.shape_cast %54 : vector<8xf32> to vector<8x1xf32>
    %cst_25 = arith.constant -5.000000e-01 : f32
    %56 = vector.broadcast %cst_25 : f32 to vector<8x1xf32>
    %57 = arith.mulf %56, %55 : vector<8x1xf32>
    %cst_26 = arith.constant dense<0.000000e+00> : vector<8x72xf32>
    %58 = tpu.matmul %22, %30, %cst_26 {dimension_numbers = #tpu.dot_dimension_numbers<[1], [0], [0], [1], [0, 0, 1, 1], [], []>} : vector<8x32xf32>, vector<32x72xf32>, vector<8x72xf32> -> vector<8x72xf32>
    %59 = vector.broadcast %5 : vector<1x72xf32> to vector<8x72xf32>
    %60 = arith.addf %58, %59 : vector<8x72xf32>
    %61 = vector.extract_strided_slice %60 {offsets = [0, 0], sizes = [8, 8], strides = [1, 1]} : vector<8x72xf32> to vector<8x8xf32>
    %62 = math.tanh %61 : vector<8x8xf32>
    %63 = vector.extract_strided_slice %60 {offsets = [0, 8], sizes = [8, 64], strides = [1, 1]} : vector<8x72xf32> to vector<8x64xf32>
    %cst_27 = arith.constant 0.000000e+00 : f32
    %64 = vector.shape_cast %10 : vector<1x64xi1> to vector<1x64xi1>
    %65 = vector.broadcast %64 : vector<1x64xi1> to vector<8x64xi1>
    %66 = vector.broadcast %cst_27 : f32 to vector<8x64xf32>
    %67 = arith.select %65, %63, %66 : vector<8x64xi1>, vector<8x64xf32>
    %68 = math.exp %63 : vector<8x64xf32>
    %cst_28 = arith.constant 0.000000e+00 : f32
    %69 = vector.shape_cast %13 : vector<1x64xi1> to vector<1x64xi1>
    %70 = vector.broadcast %69 : vector<1x64xi1> to vector<8x64xi1>
    %71 = vector.broadcast %cst_28 : f32 to vector<8x64xf32>
    %72 = arith.select %70, %68, %71 : vector<8x64xi1>, vector<8x64xf32>
    %73 = arith.addf %67, %72 : vector<8x64xf32>
    %74 = arith.subf %2, %62 : vector<8x8xf32>
    %75 = vector.shape_cast %73 : vector<8x64xf32> to vector<8x8x8xf32>
    %76 = vector.shape_cast %74 : vector<8x8xf32> to vector<8x8x1xf32>
    %77 = vector.broadcast %76 : vector<8x8x1xf32> to vector<8x8x8xf32>
    %78 = arith.mulf %75, %77 : vector<8x8x8xf32>
    %cst_29 = arith.constant dense<0.000000e+00> : vector<8x8xf32>
    %79 = vector.multi_reduction <add>, %78, %cst_29 [1] : vector<8x8x8xf32> to vector<8x8xf32>
    %80 = arith.mulf %79, %79 : vector<8x8xf32>
    %cst_30 = arith.constant dense<0.000000e+00> : vector<8xf32>
    %81 = vector.multi_reduction <add>, %80, %cst_30 [1] : vector<8x8xf32> to vector<8xf32>
    %82 = vector.shape_cast %81 : vector<8xf32> to vector<8x1xf32>
    %cst_31 = arith.constant -5.000000e-01 : f32
    %83 = vector.broadcast %cst_31 : f32 to vector<8x1xf32>
    %84 = arith.mulf %83, %82 : vector<8x1xf32>
    %85 = arith.addf %28, %57 : vector<8x1xf32>
    %86 = arith.subf %85, %84 : vector<8x1xf32>
    %c0_32 = arith.constant 0 : index
    %c0_33 = arith.constant 0 : index
    %87 = vector.load %arg5[%c0_32, %c0_33] : memref<8x1xf32, #tpu.memory_space<vmem>>, vector<8x1xf32>
    tpu.vector_store %arg5[%c0_32, %c0_33], %86 {strides = array<i32>} : memref<8x1xf32, #tpu.memory_space<vmem>>, vector<8x1xf32>,
    return
  }
  func.func @transform_0(%arg0: i32) -> (i32, i32) {
    %c0_i32 = arith.constant 0 : i32
    %c0_i32_0 = arith.constant 0 : i32
    return %arg0, %c0_i32 : i32, i32
  }
  func.func @transform_1(%arg0: i32) -> (i32, i32) {
    %c0_i32 = arith.constant 0 : i32
    %c0_i32_0 = arith.constant 0 : i32
    %c0_i32_1 = arith.constant 0 : i32
    return %c0_i32, %c0_i32_0 : i32, i32
  }
  func.func @transform_2(%arg0: i32) -> (i32, i32) {
    %c0_i32 = arith.constant 0 : i32
    %c0_i32_0 = arith.constant 0 : i32
    %c0_i32_1 = arith.constant 0 : i32
    return %c0_i32, %c0_i32_0 : i32, i32
  }
  func.func @transform_3(%arg0: i32) -> (i32, i32) {
    %c0_i32 = arith.constant 0 : i32
    %c0_i32_0 = arith.constant 0 : i32
    %c0_i32_1 = arith.constant 0 : i32
    return %c0_i32, %c0_i32_0 : i32, i32
  }
  func.func @transform_4(%arg0: i32) -> (i32, i32) {
    %c0_i32 = arith.constant 0 : i32
    %c0_i32_0 = arith.constant 0 : i32
    return %arg0, %c0_i32 : i32, i32
  }
}

</mosaic_0001>

<bundles_post_ra>
// kernel: tpu_custom_call.1
= control target key start
LH: loop header
LB: loop body
LE: loop exit
PB: predicated region body
PF: predicated region fallthrough
CT: control target
= control target key end

     0   :  { %9 = vsyncpa [#allocation3], 0  ;;  %s1306_s0 = inlined_call_operand.hbm [shape: f32[8,32], index: 0, kind: input, shape index: {}]   ;;  %s1307_s1 = inlined_call_operand.hbm [shape: f32[16,96], index: 1, kind: input, shape index: {}]   ;;  %s1308_s2 = inlined_call_operand.hbm [shape: f32[32,256], index: 2, kind: input, shape index: {}]   ;;  %s1309_s3 = inlined_call_operand.hbm [shape: f32[8,128], index: 3, kind: input, shape index: {}]   ;;  %s1310_s4 = inlined_call_operand.vmem [shape: f32[8,1], index: 4, kind: output, shape index: {}]  }
   0x1   :  { %10 = vsyncpa [#allocation5], 0  ;;  %s27_s17 = sshll.u32 %s1307_s1, 4  ;;  %s28_s17 = int_to_ptr.hbm [resolvable:$true] %s27_s17 }
   0x2   :  { %11 = vsyncpa [#allocation8], 0  ;;  %s956_s18 = smov [#allocation4]   ;;  %s17_s22 = sshll.u32 %s1306_s0, 4  ;;  %s18_s22 = int_to_ptr.hbm [resolvable:$true] %s17_s22 }
   0x3   :  { %s29_s19 = sshll.u32 %s956_s18, 4  ;;  %s957_s23 = smov 128   ;;  %s30_s19 = int_to_ptr.vmem [resolvable:$true] %s29_s19 }
   0x4   :  { %s958_s24 = smov 8   ;;  %s959_s25 = smov [#allocation2]  }
   0x5   :  { %35 = dma.hbm_to_vmem [thread:$0]  %s28_s17, 256, %s30_s19, [#allocation5], %s957_s23, %s957_s23, %s958_s24  }
   0x6   :  { %s19_s26 = sshll.u32 %s959_s25, 4  ;;  %s40_s29 = sshll.u32 %s1308_s2, 4  ;;  %s20_s26 = int_to_ptr.vmem [resolvable:$true] %s19_s26  ;;  %s41_s29 = int_to_ptr.hbm [resolvable:$true] %s40_s29 }
   0x7   :  { %22 = dma.hbm_to_vmem [thread:$0]  %s18_s22, 128, %s20_s26, [#allocation3]  }
   0x8   :  { %s960_s1 = smov [#allocation6]   ;;  %s54_s0 = sshll.u32 %s1309_s3, 4  ;;  %s55_s0 = int_to_ptr.hbm [resolvable:$true] %s54_s0 }
   0x9   :  { %s42_s30 = sshll.u32 %s960_s1, 4  ;;  %s961_s7 = smov 256   ;;  %s43_s30 = int_to_ptr.vmem [resolvable:$true] %s42_s30 }
   0xa   :  { %s962_s8 = smov 16   ;;  %s963_s9 = smov [#allocation7]  }
   0xb   :  { %48 = dma.hbm_to_vmem [thread:$0]  %s41_s29, 1024, %s43_s30, [#allocation5], %s961_s7, %s961_s7, %s962_s8  }
   0xc   :  { %s56_s10 = sshll.u32 %s963_s9, 4  ;;  %s57_s10 = int_to_ptr.vmem [resolvable:$true] %s56_s10 }
   0xd   :  { %59 = dma.hbm_to_vmem [thread:$0]  %s55_s0, 128, %s57_s10, [#allocation8]  }
   0xe   :  { %950 = dma.done.wait [#allocation3], 128  }
   0xf   :  { %951 = vsyncadd [#allocation3], 4294967168 }
  0x10   :  { %952 = dma.done.wait [#allocation5], 1280  }
  0x11   :  { %953 = vsyncadd [#allocation5], 4294966016 }
  0x12   :  { %954 = dma.done.wait [#allocation8], 128  }
  0x13   :  { %955 = vsyncadd [#allocation8], 4294967168  ;;  %v87_v0 = vld [vmem:[#allocation4 + $0x8] sm:$0xff]  ;;  %v86_v1 = vld [vmem:[#allocation4] sm:$0xff]  ;;  %vm89_vm0 = vcmask 130048   ;;  %vm116_vm1 = vcmask 261120   ;;  %v317_v21 = vlaneseq }
  0x14   :  { %107 = vmatpush.msra.mxu0 %v87_v0  ;;  %v1014_v2 = vld [vmem:[#allocation2] sm:$0xff]  ;;  %v129_v3 = vld [vmem:[#allocation6 + $0x38] sm:$0xff]  ;;  %v841_v7 = vld [vmem:[#allocation7] ss:$0 sm:$0xff]  ;;  %s964_s2 = smov 64   ;;  %s965_s3 = smov 96  }
  0x15   :  { %v128_v4 = vld [vmem:[#allocation6 + $0x28] sm:$0xff]  ;;  %489 = vmatpush.msra.mxu2 %v129_v3  ;;  %v127_v5 = vld [vmem:[#allocation6 + $0x18] sm:$0xff]  ;;  %v842_v10 = vld [vmem:[#allocation7 + $0x3] ss:$0 sm:$0xff]  ;;  %v318_v23 = vshrl.u32 %v317_v21, 7  ;;  %s966_s11 = smov 120  }
  0x16   :  { %108 = vmatpush.msra.mxu0 %v86_v1  ;;  %v126_v6 = vld [vmem:[#allocation6 + $0x8] sm:$0xff]  ;;  %v125_v14 = vld [vmem:[#allocation6 + $0x30] sm:$0xff]  ;;  %v124_v15 = vld [vmem:[#allocation6 + $0x20] sm:$0xff]  ;;  %s967_s12 = smov 24   ;;  %v968_v42 = vmov 0   ;;  %s969_s13 = smov 112  }
  0x17   :  { %809 = vmatmul.msk.f32.vlgmr.msra.gmra.mxu0 %vm89_vm0, %v1014_v2  ;;  %490 = vmatpush.msra.mxu2 %v128_v4  ;;  %v123_v16 = vld [vmem:[#allocation6 + $0x10] sm:$0xff]  ;;  %v122_v17 = vld [vmem:[#allocation6] sm:$0xff]  ;;  %v1021_v26 = vadd.s32 16, %v318_v23  ;;  %v1023_v27 = vadd.s32 24, %v318_v23  ;;  %s970_s14 = smov 104   ;;  %s971_s15 = smov 80  }
  0x18   :  { %148 = vmatpush.msra.mxu1 %v125_v14  ;;  %v844_v20 = vld [vmem:[#allocation7 + $0x2] ss:$0 sm:$0xff]  ;;  %v845_v22 = vld [vmem:[#allocation7 + $0x1] ss:$0 sm:$0xff]  ;;  %v84_v38 = vld [vmem:[#allocation7 + $0x6] sm:$0x1] }
  0x19   :  { %491 = vmatpush.msra.mxu2 %v127_v5  ;;  %833 = vset.pattern.permute.xlu1 %v1021_v26  ;;  %v82_v41 = vld [vmem:[#allocation7 + $0x5] sm:$0x1]  ;;  %vm85_vm2 = vcmp.gt.f32.partialorder %v84_v38, 0.5  ;;  %s972_s16 = smov 88   ;;  %s973_s17 = smov 72   ;;  %vm204_vm6 = vcmask 1047556  }
  0x1a   :  { %149 = vmatpush.msra.mxu1 %v124_v15  ;;  %832 = vset.pattern.permute.xlu2 %v1021_v26  ;;  %vm83_vm3 = vcmp.gt.f32.partialorder %v82_v41, 0.5  ;;  %v167_v43 = vsel %vm85_vm2, 1, %v968_v42  ;;  %vm380_vm7 = vcmask 64512   ;;  %vm453_vm8 = vcmask 1041409  }
  0x1b   :  { %492 = vmatpush.msra.mxu2 %v126_v6  ;;  %834 = vset.pattern.permute.xlu0 %v1023_v27  ;;  %v157_v45 = vsel %vm83_vm3, 1, %v968_v42  ;;  %v168_v46 = vperm.slane %v167_v43, 0  ;;  %vm455_vm9 = vcmask 1042434   ;;  %vm457_vm10 = vcmask 1043459  }
  0x1c   :  { %150 = vmatpush.msra.mxu1 %v123_v16  ;;  %v158_v48 = vperm.slane %v157_v45, 0  ;;  %vm459_vm11 = vcmask 1044484   ;;  %vm461_vm12 = vcmask 1045509   ;;  %vm463_vm13 = vcmask 1046534  }
  0x1d   :  { %vm1042_vm4 = vcmp.eq.s32.totalorder %v168_v46, 1  ;;  %vm465_vm14 = vcmask 1047559   ;;  %vm800_vm15 = vcmask 7168  }
  0x1e   :  { %151 = vmatpush.msra.mxu1 %v122_v17  ;;  %vm1046_vm5 = vcmp.eq.s32.totalorder %v158_v48, 1 }
  0x94   :  { %v110_v8 = vpop.f32.mrf.mxu0 }
  0x95   :  { %v111_v9 = vadd.f32 %v841_v7, %v110_v8 }
  0x97   :  { %v113_v11 = vmax.f32 %v111_v9, 0.0 }
  0x99   :  { %473 = vrot.lane.b32.xlu0 %v113_v11, %s964_s2  ;;  %v115_v12 = vmul.f32 %v842_v10, %v113_v11 }
  0x9b   :  { %v117_v13 = vsel %vm116_vm1, %v115_v12, 0.0 }
  0x9c   :  { %118 = vadd.xlane.f32.xlu1 %v117_v13 }
  0xa1   :  { %132 = vrot.lane.b32.xlu0 %v113_v11, %s965_s3 }
 0x10b   :  { %v474_v18 = vpop.permute.xlu0 %473 }
 0x10c   :  { %811 = vmatmul.msk.f32.vlgmr.msra.gmra.mxu2 %vm116_vm1, %v474_v18 }
 0x10f   :  { %v1038_v44 = vpop.xlane.xlu1 %118 }
 0x113   :  { %v133_v19 = vpop.permute.xlu0 %132 }
 0x114   :  { %810 = vmatmul.msk.f32.vlgmr.msra.gmra.mxu1 %vm116_vm1, %v133_v19 }
 0x18f   :  { %v494_v24 = vpop.f32.mrf.mxu2 }
 0x190   :  { %v495_v25 = vadd.f32 %v844_v20, %v494_v24 }
 0x191   :  { %v153_v28 = vpop.f32.mrf.mxu1 }
 0x192   :  { %v154_v29 = vadd.f32 %v845_v22, %v153_v28  ;;  %499 = vrot.lane.b32.xlu0 %v495_v25, %s966_s11  ;;  %846 = vtanh.f32 %v495_v25  ;;  %v503_v33 = vmul.f32 1.442695, %v495_v25  ;;  %v974_v22 = vmov 1983009808  }
 0x193   :  { %v209_v23 = vunpack.c.l.s4 %v974_v22 }
 0x194   :  { %161 = vrot.lane.b32.xlu1 %v154_v29, %s966_s11  ;;  %848 = vtanh.f32 %v154_v29  ;;  %v165_v30 = vmul.f32 1.442695, %v154_v29 }
 0x196   :  { %850 = vpow2.f32 %v165_v30 }
 0x197   :  { %852 = vpow2.f32 %v503_v33 }
 0x198   :  { %v847_v31 = vpop.eup %846 }
 0x19a   :  { %v849_v32 = vpop.eup %848 }
 0x19b   :  { %177 = vrot.lane.b32.xlu2 %v849_v32, %s962_s8 }
 0x19c   :  { %512 = vrot.lane.b32.xlu1 %v847_v31, %s967_s12  ;;  %v851_v34 = vpop.eup %850 }
 0x19d   :  { %v853_v35 = vpop.eup %852 }
 0x1a3   :  { %171 = vrot.lane.b32.xlu2 %v851_v34, %s966_s11 }
 0x1ab   :  { %506 = vrot.lane.b32.xlu2 %v853_v35, %s966_s11 }
 0x1f5   :  { %v178_v36 = vpop.permute.xlu2 %177 }
 0x1f6   :  { %v1034_v37 = vsub.f32 %v1014_v2, %v178_v36 }
 0x1f8   :  { %v323_v39 = vperm.slane %v1034_v37, 1  ;;  %v330_v40 = vperm.slane %v1034_v37, 2  ;;  %v337_v47 = vperm.slane %v1034_v37, 3  ;;  %v344_v56 = vperm.slane %v1034_v37, 4 }
 0x1f9   :  { %v351_v57 = vperm.slane %v1034_v37, 5  ;;  %v358_v7 = vperm.slane %v1034_v37, 6  ;;  %v316_v8 = vperm.slane %v1034_v37, 0  ;;  %v365_v9 = vperm.slane %v1034_v37, 7 }
 0x1fa   :  { %328 = vperm.xlu2 %832, %v323_v39   ;;  %335 = vperm.xlu1 %833, %v330_v40   ;;  %v975_v40 = vmov 1934713408  }
 0x1fb   :  { %v257_v41 = vunpack.c.l.s4 %v975_v40 }
 0x1fd   :  { %v172_v50 = vpop.permute.xlu2 %171 }
 0x1fe   :  { %v174_v53 = vsel %vm1042_vm4, %v172_v50, 0.0 }
 0x202   :  { %342 = vperm.xlu1 %833, %v337_v47   ;;  %835 = vset.pattern.permute.xlu2 %v1023_v27 }
 0x204   :  { %v500_v59 = vpop.permute.xlu0 %499 }
 0x205   :  { %v507_v60 = vpop.permute.xlu2 %506  ;;  %v502_v62 = vsel %vm1046_vm5, %v500_v59, 0.0 }
 0x206   :  { %v162_v52 = vpop.permute.xlu1 %161  ;;  %v509_v63 = vsel %vm1042_vm4, %v507_v60, 0.0 }
 0x207   :  { %v164_v54 = vsel %vm1046_vm5, %v162_v52, 0.0  ;;  %v1074_v3 = vadd.f32 %v509_v63, %v502_v62 }
 0x208   :  { %v1054_v55 = vadd.f32 %v174_v53, %v164_v54  ;;  %v1123_v53 = vunpack.c.0.s8 %v257_v41 }
 0x20a   :  { %185 = vrot.lane.b32.xlu2 %v1054_v55, %s969_s13  ;;  %182 = vrot.lane.b32.xlu0 %v1054_v55, %s966_s11  ;;  %v206_v38 = vrot.slane %v1054_v55, 4 }
 0x20b   :  { %349 = vperm.xlu1 %833, %v344_v56  }
 0x20e   :  { %v513_v58 = vpop.permute.xlu1 %512 }
 0x20f   :  { %v515_v61 = vsub.f32 %v1014_v2, %v513_v58 }
 0x211   :  { %v657_v0 = vperm.slane %v515_v61, 1  ;;  %v650_v1 = vperm.slane %v515_v61, 0  ;;  %v664_v4 = vperm.slane %v515_v61, 2  ;;  %v671_v5 = vperm.slane %v515_v61, 3 }
 0x212   :  { %191 = vrot.lane.b32.xlu2 %v1054_v55, %s965_s3  ;;  %188 = vrot.lane.b32.xlu0 %v1054_v55, %s970_s14  ;;  %v678_v2 = vperm.slane %v515_v61, 4  ;;  %v692_v6 = vperm.slane %v515_v61, 6  ;;  %v685_v10 = vperm.slane %v515_v61, 5  ;;  %v699_v11 = vperm.slane %v515_v61, 7 }
 0x213   :  { %356 = vperm.xlu1 %833, %v351_v57  }
 0x21a   :  { %197 = vrot.lane.b32.xlu2 %v1054_v55, %s971_s15  ;;  %194 = vrot.lane.b32.xlu0 %v1054_v55, %s972_s16 }
 0x21b   :  { %200 = vrot.lane.b32.xlu1 %v1054_v55, %s973_s17 }
 0x21c   :  { %838 = vset.pattern.permute.xlu1 %v1023_v27 }
 0x222   :  { %662 = vperm.xlu2 %835, %v657_v0   ;;  %655 = vperm.xlu0 %834, %v650_v1  }
 0x223   :  { %535 = vrot.lane.b32.xlu1 %v1074_v3, %s973_s17 }
 0x22a   :  { %669 = vperm.xlu2 %835, %v664_v4   ;;  %676 = vperm.xlu0 %834, %v671_v5  }
 0x22b   :  { %520 = vrot.lane.b32.xlu1 %v1074_v3, %s969_s13 }
 0x232   :  { %523 = vrot.lane.b32.xlu2 %v1074_v3, %s970_s14  ;;  %532 = vrot.lane.b32.xlu0 %v1074_v3, %s971_s15 }
 0x233   :  { %683 = vperm.xlu1 %838, %v678_v2   ;;  %837 = vset.pattern.permute.xlu2 %v1021_v26 }
 0x234   :  { %836 = vset.pattern.permute.xlu0 %v1021_v26 }
 0x23a   :  { %517 = vrot.lane.b32.xlu2 %v1074_v3, %s966_s11  ;;  %529 = vrot.lane.b32.xlu0 %v1074_v3, %s972_s16 }
 0x23b   :  { %697 = vperm.xlu1 %838, %v692_v6  }
 0x242   :  { %363 = vperm.xlu2 %837, %v358_v7   ;;  %321 = vperm.xlu0 %836, %v316_v8  }
 0x24a   :  { %839 = vset.pattern.permute.xlu2 %v1023_v27  ;;  %370 = vperm.xlu0 %836, %v365_v9  }
 0x24b   :  { %526 = vrot.lane.b32.xlu2 %v1074_v3, %s965_s3 }
 0x252   :  { %840 = vset.pattern.permute.xlu0 %v1023_v27  ;;  %v1107_v27 = vunpack.c.0.s8 %v209_v23 }
 0x253   :  { %690 = vperm.xlu2 %839, %v685_v10  }
 0x254   :  { %v1093_v12 = vpop.permute.xlu2 %328 }
 0x25b   :  { %704 = vperm.xlu2 %839, %v699_v11  }
 0x264   :  { %v186_v13 = vpop.permute.xlu2 %185 }
 0x265   :  { %v203_v21 = vrot.slane %v186_v13, 4  ;;  %v207_v45 = vsel %vm204_vm6, %v186_v13, %v206_v38 }
 0x266   :  { %v215_v57 = vperm.slane %v207_v45, %v1107_v27 }
 0x267   :  { %v205_v24 = vsel %vm204_vm6, %v203_v21, %v1054_v55 }
 0x268   :  { %v211_v32 = vperm.slane %v205_v24, %v1107_v27  ;;  %v266_v6 = vrot.slane %v215_v57, 4 }
 0x26a   :  { %v254_v43 = vrot.slane %v211_v32, 4 }
 0x26c   :  { %v192_v14 = vpop.permute.xlu2 %191  ;;  %v1095_v15 = vpop.permute.xlu1 %335 }
 0x26d   :  { %v230_v33 = vrot.slane %v192_v14, 4 }
 0x274   :  { %v198_v16 = vpop.permute.xlu2 %197  ;;  %v1097_v17 = vpop.permute.xlu1 %342 }
 0x275   :  { %v228_v31 = vrot.slane %v198_v16, 4  ;;  %v231_v36 = vsel %vm204_vm6, %v198_v16, %v230_v33 }
 0x276   :  { %v239_v46 = vperm.slane %v231_v36, %v1107_v27 }
 0x277   :  { %v229_v39 = vsel %vm204_vm6, %v228_v31, %v192_v14 }
 0x278   :  { %v235_v49 = vperm.slane %v229_v39, %v1107_v27  ;;  %v290_v59 = vrot.slane %v239_v46, 4 }
 0x27a   :  { %v278_v63 = vrot.slane %v235_v49, 4 }
 0x27c   :  { %v183_v18 = vpop.permute.xlu0 %182  ;;  %v1099_v19 = vpop.permute.xlu2 %662 }
 0x27d   :  { %v1101_v20 = vpop.permute.xlu1 %349  ;;  %v218_v28 = vrot.slane %v183_v18, 4 }
 0x284   :  { %v189_v25 = vpop.permute.xlu0 %188  ;;  %v1105_v26 = vpop.permute.xlu2 %669 }
 0x285   :  { %v216_v29 = vrot.slane %v189_v25, 4  ;;  %v1109_v30 = vpop.permute.xlu1 %356  ;;  %v219_v35 = vsel %vm204_vm6, %v189_v25, %v218_v28 }
 0x286   :  { %v227_v42 = vperm.slane %v219_v35, %v1107_v27 }
 0x287   :  { %v217_v34 = vsel %vm204_vm6, %v216_v29, %v183_v18 }
 0x288   :  { %v223_v37 = vperm.slane %v217_v34, %v1107_v27  ;;  %v264_v55 = vrot.slane %v227_v42, 4  ;;  %v267_v21 = vsel %vm204_vm6, %v227_v42, %v266_v6 }
 0x289   :  { %v1158_v38 = vperm.slane %v267_v21, %v1123_v53 }
 0x28a   :  { %v255_v50 = vsel %vm204_vm6, %v223_v37, %v254_v43  ;;  %v252_v54 = vrot.slane %v223_v37, 4  ;;  %v265_v1 = vsel %vm204_vm6, %v264_v55, %v215_v57 }
 0x28b   :  { %v263_v60 = vperm.slane %v255_v50, %v1123_v53  ;;  %v271_v16 = vperm.slane %v265_v1, %v1123_v53 }
 0x28c   :  { %v195_v47 = vpop.permute.xlu0 %194  ;;  %v524_v48 = vpop.permute.xlu2 %523  ;;  %v253_v2 = vsel %vm204_vm6, %v252_v54, %v211_v32 }
 0x28d   :  { %v242_v51 = vrot.slane %v195_v47, 4  ;;  %v201_v52 = vpop.permute.xlu1 %200  ;;  %v306_v8 = vrot.slane %v263_v60, 4  ;;  %v1147_v22 = vperm.slane %v253_v2, %v1123_v53  ;;  %v550_v29 = vrot.slane %v524_v48, 4 }
 0x28e   :  { %v240_v56 = vrot.slane %v201_v52, 4  ;;  %v310_v39 = vrot.slane %v271_v16, 4 }
 0x28f   :  { %v243_v58 = vsel %vm204_vm6, %v201_v52, %v242_v51  ;;  %v302_v41 = vrot.slane %v1147_v22, 4 }
 0x290   :  { %v241_v61 = vsel %vm204_vm6, %v240_v56, %v195_v47  ;;  %v251_v62 = vperm.slane %v243_v58, %v1107_v27 }
 0x291   :  { %v247_v0 = vperm.slane %v241_v61, %v1107_v27 }
 0x292   :  { %v288_v4 = vrot.slane %v251_v62, 4  ;;  %v291_v5 = vsel %vm204_vm6, %v251_v62, %v290_v59 }
 0x293   :  { %v279_v7 = vsel %vm204_vm6, %v247_v0, %v278_v63  ;;  %v1140_v14 = vperm.slane %v291_v5, %v1123_v53  ;;  %v276_v23 = vrot.slane %v247_v0, 4 }
 0x294   :  { %v287_v9 = vperm.slane %v279_v7, %v1123_v53  ;;  %v289_v10 = vsel %vm204_vm6, %v288_v4, %v239_v46  ;;  %v518_v11 = vpop.permute.xlu2 %517  ;;  %v1137_v13 = vpop.permute.xlu0 %655 }
 0x295   :  { %v1143_v18 = vpop.permute.xlu1 %535  ;;  %v552_v28 = vrot.slane %v518_v11, 4  ;;  %v295_v31 = vperm.slane %v289_v10, %v1123_v53  ;;  %v312_v34 = vrot.slane %v1140_v14, 4  ;;  %v551_v37 = vsel %vm204_vm6, %v550_v29, %v518_v11 }
 0x296   :  { %v304_v24 = vrot.slane %v287_v9, 4  ;;  %v307_v25 = vsel %vm204_vm6, %v287_v9, %v306_v8  ;;  %v557_v47 = vperm.slane %v551_v37, %v1107_v27  ;;  %v314_v37 = vrot.slane %v1158_v38, 4 }
 0x297   :  { %v375_v32 = vmul.f32 %v1097_v17, %v307_v25  ;;  %v553_v40 = vsel %vm204_vm6, %v524_v48, %v552_v28  ;;  %v277_v17 = vsel %vm204_vm6, %v276_v23, %v235_v49  ;;  %v308_v42 = vrot.slane %v295_v31, 4 }
 0x298   :  { %v305_v33 = vsel %vm204_vm6, %v304_v24, %v263_v60  ;;  %v313_v51 = vsel %vm204_vm6, %v312_v34, %v1158_v38  ;;  %v540_v48 = vrot.slane %v1074_v3, 4  ;;  %v311_v49 = vsel %vm204_vm6, %v295_v31, %v310_v39 }
 0x299   :  { %v374_v35 = vmul.f32 %v1095_v15, %v305_v33  ;;  %v402_v36 = vsel %vm380_vm7, %v375_v32, 0.0  ;;  %v1165_v15 = vperm.slane %v277_v17, %v1123_v53  ;;  %v561_v54 = vperm.slane %v553_v40, %v1107_v27 }
 0x29a   :  { %v403_v45 = vrot.slane %v402_v36, 4  ;;  %v309_v62 = vsel %vm204_vm6, %v308_v42, %v271_v16  ;;  %v586_v9 = vrot.slane %v557_v47, 4  ;;  %v574_v38 = vrot.slane %v1143_v18, 4 }
 0x29b   :  { %v395_v43 = vsel %vm380_vm7, %v374_v35, 0.0  ;;  %v303_v57 = vsel %vm204_vm6, %v1165_v15, %v302_v41  ;;  %v376_v11 = vmul.f32 %v1101_v20, %v309_v62  ;;  %v598_v16 = vrot.slane %v561_v54, 4 }
 0x29c   :  { %v396_v46 = vrot.slane %v395_v43, 4  ;;  %v364_v50 = vpop.permute.xlu2 %363  ;;  %v1170_v52 = vpop.permute.xlu0 %676  ;;  %v373_v60 = vmul.f32 %v1093_v12, %v303_v57  ;;  %v404_v1 = vadd.f32 %v403_v45, %v402_v36  ;;  %v377_v12 = vmul.f32 %v1109_v30, %v311_v49 }
 0x29d   :  { %v378_v55 = vmul.f32 %v364_v50, %v313_v51  ;;  %v521_v56 = vpop.permute.xlu1 %520  ;;  %v300_v41 = vrot.slane %v1165_v15, 4  ;;  %v409_v17 = vsel %vm380_vm7, %v376_v11, 0.0 }
 0x29e   :  { %v538_v58 = vrot.slane %v521_v56, 4  ;;  %v541_v59 = vsel %vm204_vm6, %v521_v56, %v540_v48  ;;  %v397_v61 = vadd.f32 %v396_v46, %v395_v43  ;;  %v388_v2 = vsel %vm380_vm7, %v373_v60, 0.0 }
 0x29f   :  { %v423_v63 = vsel %vm380_vm7, %v378_v55, 0.0  ;;  %v549_v0 = vperm.slane %v541_v59, %v1107_v27  ;;  %v389_v8 = vrot.slane %v388_v2, 4  ;;  %v416_v20 = vsel %vm380_vm7, %v377_v12, 0.0 }
 0x2a0   :  { %v424_v4 = vrot.slane %v423_v63, 4  ;;  %v539_v5 = vsel %vm204_vm6, %v538_v58, %v1074_v3  ;;  %v398_v6 = vrot.slane %v397_v61, 2  ;;  %v405_v3 = vrot.slane %v404_v1, 2 }
 0x2a1   :  { %v545_v7 = vperm.slane %v539_v5, %v1107_v27  ;;  %v600_v21 = vrot.slane %v549_v0, 4  ;;  %v390_v23 = vadd.f32 %v389_v8, %v388_v2  ;;  %v599_v32 = vsel %vm204_vm6, %v598_v16, %v549_v0 }
 0x2a2   :  { %v425_v10 = vadd.f32 %v424_v4, %v423_v63  ;;  %v399_v29 = vadd.f32 %v398_v6, %v397_v61  ;;  %v1201_v45 = vperm.slane %v599_v32, %v1123_v53  ;;  %v406_v48 = vadd.f32 %v405_v3, %v404_v1 }
 0x2a3   :  { %v588_v25 = vrot.slane %v545_v7, 4  ;;  %v587_v31 = vsel %vm204_vm6, %v586_v9, %v545_v7  ;;  %v391_v35 = vrot.slane %v390_v23, 2  ;;  %v601_v40 = vsel %vm204_vm6, %v561_v54, %v600_v21 }
 0x2a4   :  { %v426_v24 = vrot.slane %v425_v10, 2  ;;  %v533_v28 = vpop.permute.xlu0 %532  ;;  %v1198_v43 = vperm.slane %v587_v31, %v1123_v53  ;;  %v400_v46 = vrot.slane %v399_v29, 1  ;;  %v1207_v54 = vperm.slane %v601_v40, %v1123_v53 }
 0x2a5   :  { %v527_v33 = vpop.permute.xlu2 %526  ;;  %v562_v34 = vrot.slane %v533_v28, 4  ;;  %v589_v42 = vsel %vm204_vm6, %v557_v47, %v588_v25  ;;  %v392_v51 = vadd.f32 %v391_v35, %v390_v23  ;;  %v1211_v47 = vsel %vm204_vm6, %v1140_v14, %v314_v37  ;;  %v1224_v6 = vpop.permute.xlu1 %683 }
 0x2a6   :  { %v427_v30 = vadd.f32 %v426_v24, %v425_v10  ;;  %v564_v36 = vrot.slane %v527_v33, 4  ;;  %v597_v55 = vperm.slane %v589_v42, %v1123_v53  ;;  %v1216_v56 = vsel %vm204_vm6, %v300_v41, %v1147_v22 }
 0x2a7   :  { %v563_v39 = vsel %vm204_vm6, %v562_v34, %v527_v33  ;;  %v410_v57 = vrot.slane %v409_v17, 4  ;;  %v417_v58 = vrot.slane %v416_v20, 4  ;;  %v636_v59 = vrot.slane %v1198_v43, 4 }
 0x2a8   :  { %v565_v50 = vsel %vm204_vm6, %v533_v28, %v564_v36  ;;  %v428_v49 = vrot.slane %v427_v30, 1  ;;  %v569_v15 = vperm.slane %v563_v39, %v1107_v27  ;;  %v644_v60 = vrot.slane %v1201_v45, 4 }
 0x2a9   :  { %v573_v61 = vperm.slane %v565_v50, %v1107_v27  ;;  %v401_v63 = vadd.f32 %v400_v46, %v399_v29  ;;  %v393_v4 = vrot.slane %v392_v51, 1  ;;  %v407_v5 = vrot.slane %v406_v48, 1 }
 0x2aa   :  { %v429_v2 = vadd.f32 %v428_v49, %v427_v30  ;;  %v612_v22 = vrot.slane %v569_v15, 4  ;;  %v648_v8 = vrot.slane %v1207_v54, 4  ;;  %v640_v12 = vrot.slane %v597_v55, 4 }
 0x2ab   :  { %v411_v10 = vadd.f32 %v410_v57, %v409_v17  ;;  %v1230_v11 = vadd.f32 %v417_v58, %v416_v20  ;;  %v624_v16 = vrot.slane %v573_v61, 4  ;;  %v394_v28 = vadd.f32 %v393_v4, %v392_v51 }
 0x2ac   :  { %v530_v62 = vpop.permute.xlu0 %529  ;;  %v408_v29 = vadd.f32 %v407_v5, %v406_v48  ;;  %v1235_v3 = vmul.f32 %v401_v63, %v401_v63  ;;  %v1237_v31 = vmul.f32 %v429_v2, %v429_v2 }
 0x2ad   :  { %v1221_v0 = vpop.permute.xlu2 %690  ;;  %v575_v14 = vsel %vm204_vm6, %v574_v38, %v530_v62  ;;  %v576_v1 = vrot.slane %v530_v62, 4  ;;  %v412_v39 = vrot.slane %v411_v10, 2  ;;  %v419_v40 = vrot.slane %v1230_v11, 2 }
 0x2ae   :  { %v581_v7 = vperm.slane %v575_v14, %v1107_v27  ;;  %v1265_v5 = vmul.f32 %v408_v29, %v408_v29 }
 0x2af   :  { %v577_v9 = vsel %vm204_vm6, %v1143_v18, %v576_v1 }
 0x2b0   :  { %v585_v21 = vperm.slane %v577_v9, %v1107_v27  ;;  %v610_v23 = vrot.slane %v581_v7, 4  ;;  %v613_v24 = vsel %vm204_vm6, %v581_v7, %v612_v22 }
 0x2b1   :  { %v621_v25 = vperm.slane %v613_v24, %v1123_v53 }
 0x2b2   :  { %v611_v32 = vsel %vm204_vm6, %v610_v23, %v569_v15  ;;  %v622_v18 = vrot.slane %v585_v21, 4  ;;  %v625_v33 = vsel %vm204_vm6, %v585_v21, %v624_v16  ;;  %v413_v16 = vadd.f32 %v412_v39, %v411_v10 }
 0x2b3   :  { %v617_v34 = vperm.slane %v611_v32, %v1123_v53  ;;  %v638_v35 = vrot.slane %v621_v25, 4  ;;  %v641_v27 = vsel %vm204_vm6, %v621_v25, %v640_v12  ;;  %v633_v30 = vperm.slane %v625_v33, %v1123_v53 }
 0x2b4   :  { %v623_v36 = vsel %vm204_vm6, %v622_v18, %v573_v61  ;;  %v709_v37 = vmul.f32 %v1170_v52, %v641_v27  ;;  %v322_v20 = vpop.permute.xlu0 %321 }
 0x2b5   :  { %v629_v41 = vperm.slane %v623_v36, %v1123_v53  ;;  %v634_v17 = vrot.slane %v617_v34, 4  ;;  %v637_v42 = vsel %vm204_vm6, %v617_v34, %v636_v59  ;;  %v639_v46 = vsel %vm204_vm6, %v638_v35, %v597_v55  ;;  %v705_v15 = vpop.permute.xlu2 %704  ;;  %v698_v59 = vpop.permute.xlu1 %697 }
 0x2b6   :  { %v707_v38 = vmul.f32 %v1099_v19, %v637_v42  ;;  %v708_v50 = vmul.f32 %v1105_v26, %v639_v46  ;;  %v735_v51 = vsel %vm380_vm7, %v709_v37, 0.0  ;;  %v646_v48 = vrot.slane %v633_v30, 4 }
 0x2b7   :  { %v635_v52 = vsel %vm204_vm6, %v634_v17, %v1198_v43  ;;  %v736_v49 = vrot.slane %v735_v51, 4  ;;  %v649_v57 = vsel %vm204_vm6, %v633_v30, %v648_v8  ;;  %v1256_v53 = vmul.f32 %v394_v28, %v394_v28 }
 0x2b8   :  { %v706_v58 = vmul.f32 %v1137_v13, %v635_v52  ;;  %v721_v55 = vsel %vm380_vm7, %v707_v38, 0.0  ;;  %v728_v19 = vsel %vm380_vm7, %v708_v50, 0.0  ;;  %v647_v26 = vsel %vm204_vm6, %v646_v48, %v1207_v54 }
 0x2b9   :  { %v642_v61 = vrot.slane %v629_v41, 4  ;;  %v722_v62 = vrot.slane %v721_v55, 4  ;;  %v729_v63 = vrot.slane %v728_v19, 4  ;;  %v712_v43 = vmul.f32 %v698_v59, %v647_v26 }
 0x2ba   :  { %v714_v14 = vsel %vm380_vm7, %v706_v58, 0.0  ;;  %v713_v1 = vmul.f32 %v705_v15, %v649_v57  ;;  %v372_v4 = vmul.f32 %v322_v20, %v1216_v56  ;;  %v737_v7 = vadd.f32 %v736_v49, %v735_v51 }
 0x2bb   :  { %v715_v13 = vrot.slane %v714_v14, 4  ;;  %v723_v2 = vadd.f32 %v722_v62, %v721_v55  ;;  %v730_v22 = vadd.f32 %v729_v63, %v728_v19  ;;  %v756_v8 = vsel %vm380_vm7, %v712_v43, 0.0 }
 0x2bc   :  { %v763_v54 = vsel %vm380_vm7, %v713_v1, 0.0  ;;  %v381_v12 = vsel %vm380_vm7, %v372_v4, 0.0  ;;  %v371_v9 = vpop.permute.xlu0 %370  ;;  %v757_v24 = vrot.slane %v756_v8, 4  ;;  %v643_v56 = vsel %vm204_vm6, %v642_v61, %v1201_v45 }
 0x2bd   :  { %v716_v21 = vadd.f32 %v715_v13, %v714_v14  ;;  %v724_v23 = vrot.slane %v723_v2, 2  ;;  %v731_v25 = vrot.slane %v730_v22, 2  ;;  %v764_v28 = vrot.slane %v763_v54, 4 }
 0x2be   :  { %v382_v29 = vrot.slane %v381_v12, 4  ;;  %v379_v32 = vmul.f32 %v371_v9, %v1211_v47  ;;  %v738_v34 = vrot.slane %v737_v7, 2  ;;  %v420_v35 = vadd.f32 %v419_v40, %v1230_v11 }
 0x2bf   :  { %v717_v18 = vrot.slane %v716_v21, 2  ;;  %v725_v33 = vadd.f32 %v724_v23, %v723_v2  ;;  %v758_v27 = vadd.f32 %v757_v24, %v756_v8  ;;  %v645_v36 = vsel %vm204_vm6, %v629_v41, %v644_v60 }
 0x2c0   :  { %v383_v30 = vadd.f32 %v382_v29, %v381_v12  ;;  %v430_v10 = vsel %vm380_vm7, %v379_v32, 0.0  ;;  %v414_v20 = vrot.slane %v413_v16, 1  ;;  %v710_v39 = vmul.f32 %v1224_v6, %v643_v56 }
 0x2c1   :  { %v431_v37 = vrot.slane %v430_v10, 4  ;;  %v718_v17 = vadd.f32 %v717_v18, %v716_v21  ;;  %v765_v47 = vadd.f32 %v764_v28, %v763_v54  ;;  %v726_v46 = vrot.slane %v725_v33, 1 }
 0x2c2   :  { %v384_v42 = vrot.slane %v383_v30, 2  ;;  %v732_v38 = vadd.f32 %v731_v25, %v730_v22  ;;  %v421_v40 = vrot.slane %v420_v35, 1  ;;  %v711_v50 = vmul.f32 %v1221_v0, %v645_v36 }
 0x2c3   :  { %v432_v11 = vadd.f32 %v431_v37, %v430_v10  ;;  %v719_v51 = vrot.slane %v718_v17, 1  ;;  %v759_v45 = vrot.slane %v758_v27, 2  ;;  %v739_v60 = vadd.f32 %v738_v34, %v737_v7 }
 0x2c4   :  { %v385_v48 = vadd.f32 %v384_v42, %v383_v30  ;;  %v733_v6 = vrot.slane %v732_v38, 1  ;;  %v742_v49 = vsel %vm380_vm7, %v710_v39, 0.0  ;;  %v766_v15 = vrot.slane %v765_v47, 2 }
 0x2c5   :  { %v433_v41 = vrot.slane %v432_v11, 2  ;;  %v720_v52 = vadd.f32 %v719_v51, %v718_v17  ;;  %v415_v58 = vadd.f32 %v414_v20, %v413_v16  ;;  %v727_v55 = vadd.f32 %v726_v46, %v725_v33 }
 0x2c6   :  { %v386_v57 = vrot.slane %v385_v48, 1  ;;  %v422_v26 = vadd.f32 %v421_v40, %v420_v35  ;;  %v743_v59 = vrot.slane %v742_v49, 4  ;;  %v749_v0 = vsel %vm380_vm7, %v711_v50, 0.0 }
 0x2c7   :  { %v434_v19 = vadd.f32 %v433_v41, %v432_v11  ;;  %v740_v62 = vrot.slane %v739_v60, 1  ;;  %v750_v63 = vrot.slane %v749_v0, 4  ;;  %v770_v43 = vmul.f32 %v720_v52, %v720_v52  ;;  %v843_v41 = vld [vmem:[#allocation7 + $0x4] ss:$0 sm:$0xff] }
 0x2c8   :  { %v387_v61 = vadd.f32 %v386_v57, %v385_v48  ;;  %v760_v14 = vadd.f32 %v759_v45, %v758_v27  ;;  %v734_v4 = vadd.f32 %v733_v6, %v732_v38  ;;  %v744_v13 = vadd.f32 %v743_v59, %v742_v49 }
 0x2c9   :  { %v435_v1 = vrot.slane %v434_v19, 1  ;;  %v767_v2 = vadd.f32 %v766_v15, %v765_v47  ;;  %v751_v7 = vadd.f32 %v750_v63, %v749_v0  ;;  %v771_v8 = vmul.f32 %v727_v55, %v727_v55 }
 0x2ca   :  { %v437_v22 = vmul.f32 %v387_v61, %v387_v61  ;;  %v441_v12 = vmul.f32 %v415_v58, %v415_v58  ;;  %v442_v9 = vmul.f32 %v422_v26, %v422_v26  ;;  %v745_v16 = vrot.slane %v744_v13, 2 }
 0x2cb   :  { %v436_v54 = vadd.f32 %v435_v1, %v434_v19  ;;  %v741_v23 = vadd.f32 %v740_v62, %v739_v60  ;;  %v752_v24 = vrot.slane %v751_v7, 2  ;;  %v786_v56 = vsel %vm453_vm8, %v771_v8, %v770_v43 }
 0x2cc   :  { %v454_v21 = vsel %vm453_vm8, %v1256_v53, %v437_v22  ;;  %v761_v25 = vrot.slane %v760_v14, 1  ;;  %v746_v29 = vadd.f32 %v745_v16, %v744_v13  ;;  %v772_v32 = vmul.f32 %v734_v4, %v734_v4 }
 0x2cd   :  { %v456_v28 = vsel %vm455_vm9, %v1235_v3, %v454_v21  ;;  %v768_v18 = vrot.slane %v767_v2, 1  ;;  %v444_v33 = vmul.f32 %v436_v54, %v436_v54  ;;  %v753_v35 = vadd.f32 %v752_v24, %v751_v7 }
 0x2ce   :  { %v458_v34 = vsel %vm457_vm10, %v1265_v5, %v456_v28  ;;  %v747_v53 = vrot.slane %v746_v29, 1  ;;  %v787_v30 = vsel %vm455_vm9, %v772_v32, %v786_v56  ;;  %v773_v37 = vmul.f32 %v741_v23, %v741_v23 }
 0x2cf   :  { %v460_v27 = vsel %vm459_vm11, %v441_v12, %v458_v34  ;;  %v754_v36 = vrot.slane %v753_v35, 1  ;;  %v762_v20 = vadd.f32 %v761_v25, %v760_v14  ;;  %v769_v5 = vadd.f32 %v768_v18, %v767_v2 }
 0x2d0   :  { %v462_v10 = vsel %vm461_vm12, %v442_v9, %v460_v27  ;;  %v748_v39 = vadd.f32 %v747_v53, %v746_v29  ;;  %v788_v42 = vsel %vm457_vm10, %v773_v37, %v787_v30  ;;  %v121_v49 = vadd.f32 %v843_v41, %v1038_v44 }
 0x2d1   :  { %v464_v3 = vsel %vm463_vm13, %v1237_v31, %v462_v10  ;;  %v755_v47 = vadd.f32 %v754_v36, %v753_v35  ;;  %v776_v40 = vmul.f32 %v762_v20, %v762_v20  ;;  %v777_v51 = vmul.f32 %v769_v5, %v769_v5 }
 0x2d2   :  { %v466_v17 = vsel %vm465_vm14, %v444_v33, %v464_v3  ;;  %v774_v38 = vmul.f32 %v748_v39, %v748_v39 }
 0x2d3   :  { %v468_v46 = vsel %vm380_vm7, %v466_v17, 0.0  ;;  %v775_v11 = vmul.f32 %v755_v47, %v755_v47 }
 0x2d4   :  { %469 = vadd.xlane.f32.xlu1 %v468_v46  ;;  %v789_v50 = vsel %vm459_vm11, %v774_v38, %v788_v42 }
 0x2d5   :  { %v790_v45 = vsel %vm461_vm12, %v775_v11, %v789_v50 }
 0x2d6   :  { %v791_v31 = vsel %vm463_vm13, %v776_v40, %v790_v45 }
 0x2d7   :  { %v792_v48 = vsel %vm465_vm14, %v777_v51, %v791_v31 }
 0x2d8   :  { %v794_v60 = vsel %vm380_vm7, %v792_v48, 0.0 }
 0x2d9   :  { %795 = vadd.xlane.f32.xlu0 %v794_v60 }
 0x347   :  { %v470_v52 = vpop.xlane.xlu1 %469 }
 0x348   :  { %v471_v6 = vmul.f32 -0.5, %v470_v52 }
 0x34a   :  { %v798_v15 = vadd.f32 %v471_v6, %v121_v49 }
 0x34c   :  { %v796_v57 = vpop.xlane.xlu0 %795 }
 0x34d   :  { %v797_v58 = vmul.f32 -0.5, %v796_v57 }
 0x34f   :  { %v799_v55 = vsub.f32 %v798_v15, %v797_v58 }
 0x351   :  { %801 = vst.msk [vmem:[%s1310_s4] sm:$0xff] %vm800_vm15, %v799_v55 }
 0x352   :  { %806 = vsyncpa [#allocation3], 1 }
 0x353   :  { %807 = vsyncpa [#allocation5], 1 }
 0x354   :  { %808 = vsyncpa [#allocation8], 1 }

</bundles_post_ra>
